<compile_context>
chip_gen: v7x
topology: tpu7x:2x2x1
jax: 0.10.0
libtpu: 0.0.40
codegen_flags: <defaults>
</compile_context>

<pallas_src>
import jax
import jax.numpy as jnp
from jax.experimental import pallas as pl
from jax.experimental.pallas import tpu as pltpu


# --------------------------------------------------------------------------- #
# Kernel: one grid step = one tower (fc1 + relu + fc2 + batchnorm + L2 norm)   #
# --------------------------------------------------------------------------- #
def _towers_kernel(x_ref, w1_ref, b1_ref, w2_ref, b2_ref, g_ref, bt_ref, o_ref):
    # fc1 + ReLU
    h = jnp.dot(x_ref[...], w1_ref[...], preferred_element_type=jnp.float32)
    h = jnp.maximum(h + b1_ref[...], 0.0)
    # fc2
    z = jnp.dot(h, w2_ref[...], preferred_element_type=jnp.float32) + b2_ref[...]
    # BatchNorm1d (training mode: batch mean / biased batch variance, eps=1e-5)
    mean = jnp.mean(z, axis=0, keepdims=True)
    d = z - mean
    var = jnp.mean(d * d, axis=0, keepdims=True)
    zn = d * jax.lax.rsqrt(var + 1e-5) * g_ref[...] + bt_ref[...]
    # F.normalize: x / max(||x||_2, 1e-12) along dim=1
    #   == x * rsqrt(max(||x||^2, 1e-24))  (rsqrt -> EUP slot, no VPU divide)
    sq = jnp.sum(zn * zn, axis=1, keepdims=True)
    inv = jax.lax.rsqrt(jnp.maximum(sq, 1e-24))
    o_ref[...] = (zn * inv).astype(o_ref.dtype)


# --------------------------------------------------------------------------- #
# Wrapper                                                                      #
# --------------------------------------------------------------------------- #
def _round_up(n, m):
    return ((n + m - 1) // m) * m


def _pad2(x, rows, cols):
    return jnp.pad(x, ((0, rows - x.shape[0]), (0, cols - x.shape[1])))


def _fused_towers(X, W1, b1, W2, b2, gamma, beta):
    """X: [T,B,Fin], W1: [T,Fin,FC], b1: [T,1,FC], W2: [T,FC,E], b2/g/bt: [T,1,E]."""
    n_towers, B, F_in = X.shape
    FC = W1.shape[2]
    E = W2.shape[2]

    def tower_spec(shape):
        # Leading tower dim is size-1 and squeezed out of the kernel Ref.
        return pl.BlockSpec((None,) + shape, lambda t: (t,) + (0,) * len(shape))

    flops = 2 * n_towers * B * (F_in * FC + FC * E)
    bytes_accessed = 4 * (X.size + W1.size + b1.size + W2.size + b2.size
                          + gamma.size + beta.size + n_towers * B * E)
    # Double-buffered blocks + headroom for intermediates (h, z) and spills.
    vmem_limit = int(min(128 << 20, 2 * bytes_accessed + 8 * B * max(FC, E) + (8 << 20)))

    return pl.pallas_call(
        _towers_kernel,
        out_shape=jax.ShapeDtypeStruct((n_towers, B, E), jnp.float32),
        grid=(n_towers,),
        in_specs=[
            tower_spec((B, F_in)),   # X
            tower_spec((F_in, FC)),  # W1
            tower_spec((1, FC)),     # b1
            tower_spec((FC, E)),     # W2
            tower_spec((1, E)),      # b2
            tower_spec((1, E)),      # gamma
            tower_spec((1, E)),      # beta
        ],
        out_specs=tower_spec((B, E)),
        compiler_params=pltpu.CompilerParams(
            dimension_semantics=("parallel",),   # shard towers across TCs (v7x)
            vmem_limit_bytes=vmem_limit,
        ),
        cost_estimate=pl.CostEstimate(
            flops=flops,
            transcendentals=n_towers * (B + E),
            bytes_accessed=bytes_accessed,
        ),
    )(X, W1, b1, W2, b2, gamma, beta)


def embedding_model_forward(X_img, X_txt, params):
    """Returns (Y_img, Y_txt), each [batch, embed_dim], L2-normalized rows."""
    B, IMG = X_img.shape
    TXT = X_txt.shape[1]
    FC = params["img_w1"].shape[1]
    EMB = params["img_w2"].shape[1]

    # Lane-dense padding (multiples of 128 on feature axes). Zero padding is
    # inert: padded input cols are 0, padded z cols are exactly 0, padded beta
    # is 0, so BN/L2 results on real columns are unchanged.
    F_in = _round_up(max(IMG, TXT), 128)
    FC_p = _round_up(FC, 128)
    E_p = _round_up(EMB, 128)

    X = jnp.stack([_pad2(X_img, B, F_in), _pad2(X_txt, B, F_in)])
    W1 = jnp.stack([_pad2(params["img_w1"], F_in, FC_p),
                    _pad2(params["txt_w1"], F_in, FC_p)])
    b1 = jnp.stack([_pad2(params["img_b1"], 1, FC_p),
                    _pad2(params["txt_b1"], 1, FC_p)])
    W2 = jnp.stack([_pad2(params["img_w2"], FC_p, E_p),
                    _pad2(params["txt_w2"], FC_p, E_p)])
    b2 = jnp.stack([_pad2(params["img_b2"], 1, E_p),
                    _pad2(params["txt_b2"], 1, E_p)])
    gamma = jnp.stack([_pad2(params["img_gamma"], 1, E_p),
                       _pad2(params["txt_gamma"], 1, E_p)])
    beta = jnp.stack([_pad2(params["img_beta"], 1, E_p),
                      _pad2(params["txt_beta"], 1, E_p)])

    Y = _fused_towers(X, W1, b1, W2, b2, gamma, beta)
    return Y[0, :, :EMB], Y[1, :, :EMB]


# --------------------------------------------------------------------------- #
# Params / reference                                                           #
# --------------------------------------------------------------------------- #
def init_params(key, txt_features, img_features, fc_features, embed_dim):
    ks = jax.random.split(key, 8)

    def linear(kw, kb, fan_in, fan_out):
        # PyTorch-style uniform(-1/sqrt(fan_in), 1/sqrt(fan_in)); weight stored [in, out].
        bound = 1.0 / jnp.sqrt(fan_in)
        w = jax.random.uniform(kw, (fan_in, fan_out), jnp.float32, -bound, bound)
        b = jax.random.uniform(kb, (1, fan_out), jnp.float32, -bound, bound)
        return w, b

    img_w1, img_b1 = linear(ks[0], ks[1], img_features, fc_features)
    img_w2, img_b2 = linear(ks[2], ks[3], fc_features, embed_dim)
    txt_w1, txt_b1 = linear(ks[4], ks[5], txt_features, fc_features)
    txt_w2, txt_b2 = linear(ks[6], ks[7], fc_features, embed_dim)
    ones = jnp.ones((1, embed_dim), jnp.float32)
    zeros = jnp.zeros((1, embed_dim), jnp.float32)
    return dict(
        img_w1=img_w1, img_b1=img_b1, img_w2=img_w2, img_b2=img_b2,
        img_gamma=ones, img_beta=zeros,
        txt_w1=txt_w1, txt_b1=txt_b1, txt_w2=txt_w2, txt_b2=txt_b2,
        txt_gamma=ones, txt_beta=zeros,
    )


def _reference(X_img, X_txt, p):
    def branch(x, w1, b1, w2, b2, g, bt):
        h = jnp.maximum(x @ w1 + b1, 0.0)
        z = h @ w2 + b2
        mean = jnp.mean(z, axis=0, keepdims=True)
        var = jnp.mean((z - mean) ** 2, axis=0, keepdims=True)
        zn = (z - mean) / jnp.sqrt(var + 1e-5) * g + bt
        n = jnp.maximum(jnp.linalg.norm(zn, axis=1, keepdims=True), 1e-12)
        return zn / n
    return (
        branch(X_img, p["img_w1"], p["img_b1"], p["img_w2"], p["img_b2"],
               p["img_gamma"], p["img_beta"]),
        branch(X_txt, p["txt_w1"], p["txt_b1"], p["txt_w2"], p["txt_b2"],
               p["txt_gamma"], p["txt_beta"]),
    )


if __name__ == "__main__":
    # Small shapes consistent with the module's interface.
    B, TXT, IMG, FC, EMB = 8, 32, 128, 128, 64

    key = jax.random.PRNGKey(0)
    k_img, k_txt, k_param = jax.random.split(key, 3)
    X_img = jax.random.normal(k_img, (B, IMG), jnp.float32)
    X_txt = jax.random.normal(k_txt, (B, TXT), jnp.float32)
    params = init_params(k_param, TXT, IMG, FC, EMB)

    Y_img, Y_txt = embedding_model_forward(X_img, X_txt, params)
    jax.block_until_ready((Y_img, Y_txt))

    R_img, R_txt = _reference(X_img, X_txt, params)
    assert Y_img.shape == (B, EMB) and Y_txt.shape == (B, EMB)
    assert jnp.allclose(Y_img, R_img, atol=1e-4, rtol=1e-4)
    assert jnp.allclose(Y_txt, R_txt, atol=1e-4, rtol=1e-4)

    print("KERNEL_OK")
</pallas_src>

<mosaic_0001>
module attributes {stable_mosaic.version = 11 : i64} {
  func.func @_towers_kernel(%arg0: i32, %arg1: memref<1x8x128xf32, #tpu.memory_space<vmem>>, %arg2: memref<1x128x128xf32, #tpu.memory_space<vmem>>, %arg3: memref<1x1x128xf32, #tpu.memory_space<vmem>>, %arg4: memref<1x128x128xf32, #tpu.memory_space<vmem>>, %arg5: memref<1x1x128xf32, #tpu.memory_space<vmem>>, %arg6: memref<1x1x128xf32, #tpu.memory_space<vmem>>, %arg7: memref<1x1x128xf32, #tpu.memory_space<vmem>>, %arg8: memref<1x8x128xf32, #tpu.memory_space<vmem>>) attributes {dimension_semantics = [#tpu.dimension_semantics<parallel>], iteration_bounds = array<i64: 2>, scalar_prefetch = 0 : i64, scratch_operands = 0 : i64, tpu.core_type = #tpu.core_type<tc>, window_params = [{transform_indices = @transform_0, window_bounds = array<i64: 1, 8, 128>}, {transform_indices = @transform_1, window_bounds = array<i64: 1, 128, 128>}, {transform_indices = @transform_2, window_bounds = array<i64: 1, 1, 128>}, {transform_indices = @transform_3, window_bounds = array<i64: 1, 128, 128>}, {transform_indices = @transform_4, window_bounds = array<i64: 1, 1, 128>}, {transform_indices = @transform_5, window_bounds = array<i64: 1, 1, 128>}, {transform_indices = @transform_6, window_bounds = array<i64: 1, 1, 128>}, {transform_indices = @transform_7, window_bounds = array<i64: 1, 8, 128>}]} {
    %c0 = arith.constant 0 : index
    %c0_0 = arith.constant 0 : index
    %c0_1 = arith.constant 0 : index
    %0 = vector.load %arg1[%c0, %c0_0, %c0_1] : memref<1x8x128xf32, #tpu.memory_space<vmem>>, vector<1x8x128xf32>
    %1 = vector.shape_cast %0 : vector<1x8x128xf32> to vector<8x128xf32>
    %c0_2 = arith.constant 0 : index
    %c0_3 = arith.constant 0 : index
    %c0_4 = arith.constant 0 : index
    %2 = vector.load %arg2[%c0_2, %c0_3, %c0_4] : memref<1x128x128xf32, #tpu.memory_space<vmem>>, vector<1x128x128xf32>
    %3 = vector.shape_cast %2 : vector<1x128x128xf32> to vector<128x128xf32>
    %cst = arith.constant dense<0.000000e+00> : vector<8x128xf32>
    %4 = tpu.matmul %1, %3, %cst {dimension_numbers = #tpu.dot_dimension_numbers<[1], [0], [0], [1], [0, 0, 1, 1], [], []>} : vector<8x128xf32>, vector<128x128xf32>, vector<8x128xf32> -> vector<8x128xf32>
    %c0_5 = arith.constant 0 : index
    %c0_6 = arith.constant 0 : index
    %c0_7 = arith.constant 0 : index
    %5 = vector.load %arg3[%c0_5, %c0_6, %c0_7] : memref<1x1x128xf32, #tpu.memory_space<vmem>>, vector<1x1x128xf32>
    %6 = vector.shape_cast %5 : vector<1x1x128xf32> to vector<1x128xf32>
    %7 = vector.broadcast %6 : vector<1x128xf32> to vector<8x128xf32>
    %8 = arith.addf %4, %7 : vector<8x128xf32>
    %cst_8 = arith.constant 0.000000e+00 : f32
    %9 = vector.broadcast %cst_8 : f32 to vector<8x128xf32>
    %10 = arith.maximumf %8, %9 : vector<8x128xf32>
    %c0_9 = arith.constant 0 : index
    %c0_10 = arith.constant 0 : index
    %c0_11 = arith.constant 0 : index
    %11 = vector.load %arg4[%c0_9, %c0_10, %c0_11] : memref<1x128x128xf32, #tpu.memory_space<vmem>>, vector<1x128x128xf32>
    %12 = vector.shape_cast %11 : vector<1x128x128xf32> to vector<128x128xf32>
    %cst_12 = arith.constant dense<0.000000e+00> : vector<8x128xf32>
    %13 = tpu.matmul %10, %12, %cst_12 {dimension_numbers = #tpu.dot_dimension_numbers<[1], [0], [0], [1], [0, 0, 1, 1], [], []>} : vector<8x128xf32>, vector<128x128xf32>, vector<8x128xf32> -> vector<8x128xf32>
    %c0_13 = arith.constant 0 : index
    %c0_14 = arith.constant 0 : index
    %c0_15 = arith.constant 0 : index
    %14 = vector.load %arg5[%c0_13, %c0_14, %c0_15] : memref<1x1x128xf32, #tpu.memory_space<vmem>>, vector<1x1x128xf32>
    %15 = vector.shape_cast %14 : vector<1x1x128xf32> to vector<1x128xf32>
    %16 = vector.broadcast %15 : vector<1x128xf32> to vector<8x128xf32>
    %17 = arith.addf %13, %16 : vector<8x128xf32>
    %cst_16 = arith.constant dense<0.000000e+00> : vector<128xf32>
    %18 = vector.multi_reduction <add>, %17, %cst_16 [0] : vector<8x128xf32> to vector<128xf32>
    %19 = vector.shape_cast %18 : vector<128xf32> to vector<1x128xf32>
    %cst_17 = arith.constant 8.000000e+00 : f32
    %20 = vector.broadcast %cst_17 : f32 to vector<1x128xf32>
    %21 = arith.divf %19, %20 : vector<1x128xf32>
    %22 = vector.broadcast %21 : vector<1x128xf32> to vector<8x128xf32>
    %23 = arith.subf %17, %22 : vector<8x128xf32>
    %24 = arith.mulf %23, %23 : vector<8x128xf32>
    %cst_18 = arith.constant dense<0.000000e+00> : vector<128xf32>
    %25 = vector.multi_reduction <add>, %24, %cst_18 [0] : vector<8x128xf32> to vector<128xf32>
    %26 = vector.shape_cast %25 : vector<128xf32> to vector<1x128xf32>
    %cst_19 = arith.constant 8.000000e+00 : f32
    %27 = vector.broadcast %cst_19 : f32 to vector<1x128xf32>
    %28 = arith.divf %26, %27 : vector<1x128xf32>
    %cst_20 = arith.constant 9.99999974E-6 : f32
    %29 = vector.broadcast %cst_20 : f32 to vector<1x128xf32>
    %30 = arith.addf %28, %29 : vector<1x128xf32>
    %31 = math.rsqrt %30 : vector<1x128xf32>
    %32 = vector.broadcast %31 : vector<1x128xf32> to vector<8x128xf32>
    %33 = arith.mulf %23, %32 : vector<8x128xf32>
    %c0_21 = arith.constant 0 : index
    %c0_22 = arith.constant 0 : index
    %c0_23 = arith.constant 0 : index
    %34 = vector.load %arg6[%c0_21, %c0_22, %c0_23] : memref<1x1x128xf32, #tpu.memory_space<vmem>>, vector<1x1x128xf32>
    %35 = vector.shape_cast %34 : vector<1x1x128xf32> to vector<1x128xf32>
    %36 = vector.broadcast %35 : vector<1x128xf32> to vector<8x128xf32>
    %37 = arith.mulf %33, %36 : vector<8x128xf32>
    %c0_24 = arith.constant 0 : index
    %c0_25 = arith.constant 0 : index
    %c0_26 = arith.constant 0 : index
    %38 = vector.load %arg7[%c0_24, %c0_25, %c0_26] : memref<1x1x128xf32, #tpu.memory_space<vmem>>, vector<1x1x128xf32>
    %39 = vector.shape_cast %38 : vector<1x1x128xf32> to vector<1x128xf32>
    %40 = vector.broadcast %39 : vector<1x128xf32> to vector<8x128xf32>
    %41 = arith.addf %37, %40 : vector<8x128xf32>
    %42 = arith.mulf %41, %41 : vector<8x128xf32>
    %cst_27 = arith.constant dense<0.000000e+00> : vector<8xf32>
    %43 = vector.multi_reduction <add>, %42, %cst_27 [1] : vector<8x128xf32> to vector<8xf32>
    %44 = vector.shape_cast %43 : vector<8xf32> to vector<8x1xf32>
    %cst_28 = arith.constant 1.000000e-24 : f32
    %45 = vector.broadcast %cst_28 : f32 to vector<8x1xf32>
    %46 = arith.maximumf %44, %45 : vector<8x1xf32>
    %47 = math.rsqrt %46 : vector<8x1xf32>
    %48 = vector.broadcast %47 : vector<8x1xf32> to vector<8x128xf32>
    %49 = arith.mulf %41, %48 : vector<8x128xf32>
    %c0_29 = arith.constant 0 : index
    %c0_30 = arith.constant 0 : index
    %c0_31 = arith.constant 0 : index
    %50 = vector.load %arg8[%c0_29, %c0_30, %c0_31] : memref<1x8x128xf32, #tpu.memory_space<vmem>>, vector<1x8x128xf32>
    %51 = vector.shape_cast %50 : vector<1x8x128xf32> to vector<8x128xf32>
    %52 = vector.shape_cast %49 : vector<8x128xf32> to vector<1x8x128xf32>
    tpu.vector_store %arg8[%c0_29, %c0_30, %c0_31], %52 {strides = array<i32>} : memref<1x8x128xf32, #tpu.memory_space<vmem>>, vector<1x8x128xf32>,
    return
  }
  func.func @transform_0(%arg0: i32) -> (i32, i32, i32) {
    %c0_i32 = arith.constant 0 : i32
    %c0_i32_0 = arith.constant 0 : i32
    %c0_i32_1 = arith.constant 0 : i32
    return %arg0, %c0_i32, %c0_i32_0 : i32, i32, i32
  }
  func.func @transform_1(%arg0: i32) -> (i32, i32, i32) {
    %c0_i32 = arith.constant 0 : i32
    %c0_i32_0 = arith.constant 0 : i32
    %c0_i32_1 = arith.constant 0 : i32
    return %arg0, %c0_i32, %c0_i32_0 : i32, i32, i32
  }
  func.func @transform_2(%arg0: i32) -> (i32, i32, i32) {
    %c0_i32 = arith.constant 0 : i32
    %c0_i32_0 = arith.constant 0 : i32
    %c0_i32_1 = arith.constant 0 : i32
    return %arg0, %c0_i32, %c0_i32_0 : i32, i32, i32
  }
  func.func @transform_3(%arg0: i32) -> (i32, i32, i32) {
    %c0_i32 = arith.constant 0 : i32
    %c0_i32_0 = arith.constant 0 : i32
    %c0_i32_1 = arith.constant 0 : i32
    return %arg0, %c0_i32, %c0_i32_0 : i32, i32, i32
  }
  func.func @transform_4(%arg0: i32) -> (i32, i32, i32) {
    %c0_i32 = arith.constant 0 : i32
    %c0_i32_0 = arith.constant 0 : i32
    %c0_i32_1 = arith.constant 0 : i32
    return %arg0, %c0_i32, %c0_i32_0 : i32, i32, i32
  }
  func.func @transform_5(%arg0: i32) -> (i32, i32, i32) {
    %c0_i32 = arith.constant 0 : i32
    %c0_i32_0 = arith.constant 0 : i32
    %c0_i32_1 = arith.constant 0 : i32
    return %arg0, %c0_i32, %c0_i32_0 : i32, i32, i32
  }
  func.func @transform_6(%arg0: i32) -> (i32, i32, i32) {
    %c0_i32 = arith.constant 0 : i32
    %c0_i32_0 = arith.constant 0 : i32
    %c0_i32_1 = arith.constant 0 : i32
    return %arg0, %c0_i32, %c0_i32_0 : i32, i32, i32
  }
  func.func @transform_7(%arg0: i32) -> (i32, i32, i32) {
    %c0_i32 = arith.constant 0 : i32
    %c0_i32_0 = arith.constant 0 : i32
    %c0_i32_1 = arith.constant 0 : i32
    return %arg0, %c0_i32, %c0_i32_0 : i32, i32, i32
  }
}

</mosaic_0001>

<bundles_post_ra>
// kernel: tpu_custom_call.1
= control target key start
LH: loop header
LB: loop body
LE: loop exit
PB: predicated region body
PF: predicated region fallthrough
CT: control target
= control target key end

     0   :  { %s1594_s0 = inlined_call_operand.hbm [shape: f32[2,8,128], index: 0, kind: input, shape index: {}]   ;;  %s1595_s1 = inlined_call_operand.hbm [shape: f32[2,128,128], index: 1, kind: input, shape index: {}]   ;;  %s1596_s2 = inlined_call_operand.vmem [shape: f32[2,1,128], index: 2, kind: input, shape index: {}]   ;;  %s1597_s3 = inlined_call_operand.hbm [shape: f32[2,128,128], index: 3, kind: input, shape index: {}]   ;;  %s1598_s4 = inlined_call_operand.vmem [shape: f32[2,1,128], index: 4, kind: input, shape index: {}]   ;;  %s1599_s5 = inlined_call_operand.vmem [shape: f32[2,1,128], index: 5, kind: input, shape index: {}]   ;;  %s1600_s6 = inlined_call_operand.vmem [shape: f32[2,1,128], index: 6, kind: input, shape index: {}]   ;;  %s1601_s7 = inlined_call_operand.hbm [shape: f32[2,8,128], index: 7, kind: output, shape index: {}]  }
   0x1   :  { %1615 = sst [smem:[#allocation17_spill]] %s1595_s1 }
   0x2   :  { %12 = vsyncpa [#allocation3], 0 }
   0x3   :  { %14 = vsyncpa [#allocation3 + $0x1], 0 }
   0x4   :  { %15 = vsyncpa [#allocation6], 0 }
   0x5   :  { %17 = vsyncpa [#allocation6 + $0x1], 0 }
   0x6   :  { %18 = vsyncpa [#allocation4], 0 }
   0x7   :  { %20 = vsyncpa [#allocation4 + $0x1], 0  ;;  %s1275_s24 = smov 0   ;;  %s1277_s25 = smov 0  }
   0x8   :  { %s1279_s26 = smov 0   ;;  %s1281_s27 = smov 0  }
   0x9 LB: > { %1616 = sst [smem:[#allocation12_spill]] %s1220_s26  ;;  %s1296_s28 = sadd.s32 4294967295, %s1224_s27   ;;  %s1224_s27 = sphi %s1281_s27, %s1640_s27   ;;  %s1220_s26 = sphi %s1279_s26, %s1642_s26   ;;  %s1216_s25 = sphi %s1277_s25, %s1644_s25   ;;  %s1212_s24 = sphi %s1275_s24, %s1643_s24  }
   0xa   : > { %1617 = sst [smem:[#allocation13_spill]] %s1224_s27  ;;  %s821_s29 = sadd.s32 4294967294, %s1224_s27  }
   0xb   : > { %s1300_s30 = sadd.s32 1, %s1224_s27   ;;  %s33_s8 = sadd.s32 1, %s1220_s26 }
   0xc   : > { %1618 = sst [smem:[#allocation14_spill]] %s1300_s30  ;;  %s30_s9 = ssub.s32 %s1224_s27, %s1300_s30 }
   0xd   : > { %p40_p0 = scmp.ne.s32.totalorder %s1220_s26, %s1216_s25  ;;  %p31_p1 = scmp.eq.s32.totalorder %s30_s9, 0 }
   0xe   : > { %p41_p2 = scmp.eq.s32.totalorder %s1224_s27, 0  ;;  %p46_p3 = scmp.ne.s32.totalorder %s1216_s25, %s1212_s24 }
   0xf   : > { %p47_p4 = scmp.eq.s32.totalorder %s1296_s28, 0  ;;  %p226_p7 = scmp.eq.s32.totalorder %s1296_s28, 1 }
  0x10   : > { %s1312_s10 = scalar_select %p31_p1, %s1220_s26, %s33_s8  }
  0x11   : > { %p42_p5 = por %p41_p2, %p40_p0  ;;  %p1314_p6 = por %p47_p4, %p46_p3 }
  0x12   : > { %1619 = sst [smem:[#allocation15_spill]] %s1312_s10  ;;  %p232_p8 = scmp.eq.s32.totalorder %s821_s29, 1 }
  0x13   : > { %s1620_s11 = scalar_select %p1314_p6, 1, 0 }
  0x14   : > { %p1021_p10 = scmp.lt.s32.totalorder %s1224_s27, 2  ;;  %p1321_p11 = por %p226_p7, %p40_p0 }
  0x15   : > { %p1325_p12 = por %p232_p8, %p46_p3  ;;  %s1330_s14 = sand.u32 1, %s1220_s26  }
  0x16   : > { %s1621_s12 = scalar_select %p1321_p11, 1, 0 }
  0x17   : > { %s1622_s13 = scalar_select %p1325_p12, 1, 0 }
  0x18   : > { %p1332_p13 = pnand %p1021_p10, %p42_p5  ;;  %s270_s16 = sand.u32 1, %s1224_s27  }
  0x19   : > { %1623 = sst [smem:[#allocation16_spill]] %s1622_s13  ;;  %s1602_s17 = sshll.u32 %s1330_s14, 7 }
  0x1a   : > { %s1624_s15 = scalar_select %p1332_p13, 1, 0 }
  0x1b   : > { %s1603_s18 = sshll.u32 %s1224_s27, 11  ;;  %s1625_s1 = sld [smem:[#allocation17_spill]] }
  0x1c   : > { %s274_s22 = scalar_lea.vmem [#allocation5], %s1602_s17  ;;  %s1350_s29 = scalar_lea.sflag [#allocation6], %s270_s16 }
  0x1d   : > { %s281_s23 = sshll.u32 %s274_s22, 4  ;;  %p1356_p1 = pneg %p1332_p13  ;;  %s1348_s23 = int_to_ptr.vmem [resolvable:$true] %s281_s23 }
  0x21   : > { %s1344_s21 = scalar_lea.hbm %s1625_s1, %s1603_s18  ;;  %s1069_s17 = scalar_lea.hbm %s1625_s1, 4096 }
  0x22   : > { %s1064_s8 = scalar_lea.hbm %s1344_s21, 2048  ;;  %p1070_p4 = scmp.lt.u32.totalorder %s1344_s21, %s1625_s1 }
  0x23   : > { %p1065_p0 = scmp.ne.s32.totalorder %s1344_s21, %s1064_s8  ;;  %p1071_p5 = scmp.lt.u32.totalorder %s1069_s17, %s1064_s8 }
  0x24   : > { %p1073_p8 = scmp.lt.u32.totalorder %s1064_s8, %s1344_s21 }
  0x25   : > { %p1067_p2 = pnand %p1356_p1, %p1065_p0  ;;  %p1072_p7 = por %p1071_p5, %p1070_p4 }
  0x27   : > { %p1068_p3 = pneg %p1067_p2  ;;  %p1074_p10 = por %p1073_p8, %p1072_p7 }
  0x29   : > { %p1075_p9 = pnand %p1074_p10, %p1068_p3 }
  0x2b   : > { %1078 = shalt.err (!%p1075_p9)
}
  0x2c   : > { %s1079_s16 = scalar_lea.vmem %s1348_s23, 2048  ;;  %s1226_s19 = smov [#allocation5]  }
  0x2d   : > { %p1080_p0 = scmp.ne.s32.totalorder %s1348_s23, %s1079_s16  ;;  %s1084_s20 = sshll.u32 %s1226_s19, 4  ;;  %s1085_s20 = int_to_ptr.vmem [resolvable:$false] %s1084_s20 }
  0x2e   : > { %s1086_s18 = scalar_lea.vmem %s1085_s20, 4096  ;;  %p1087_p11 = scmp.lt.s32.totalorder %s1348_s23, %s1085_s20 }
  0x2f   : > { %p1082_p2 = pnand %p1080_p0, %p1356_p1  ;;  %p1088_p6 = scmp.lt.s32.totalorder %s1086_s18, %s1079_s16 }
  0x31   : > { %p1083_p12 = pneg %p1082_p2  ;;  %p1089_p4 = por %p1088_p6, %p1087_p11 }
  0x33   : > { %p1090_p5 = pnand %p1089_p4, %p1083_p12 }
  0x35   : > { %1093 = shalt.err (!%p1090_p5)
}
  0x36   : > { %s1610_s17 = smov 128   ;;  %s1611_s8 = smov 8  }
  0x37   : > { %1013 = dma.hbm_to_vmem [thread:$0]  (!%p1332_p13), %s1344_s21, 2048, %s1348_s23, %s1350_s29, %s1610_s17, %s1610_s17, %s1611_s8  }
  0x38   : > { %s1627_s22 = sshll.u32 %s1224_s27, 11  ;;  %s1628_s18 = sshll.u32 %s1330_s14, 7 }
  0x39   : > { %s1388_s20 = scalar_lea.hbm %s1597_s3, %s1627_s22  ;;  %s301_s1 = scalar_lea.vmem [#allocation7], %s1628_s18 }
  0x3a   : > { %s308_s10 = sshll.u32 %s301_s1, 4  ;;  %p832_p6 = scmp.ge.s32.totalorder %s1224_s27, 1  ;;  %s1392_s10 = int_to_ptr.vmem [resolvable:$true] %s308_s10 }
  0x3b   : > { %p334_p9 = scmp.lt.s32.totalorder %s1224_s27, 3  ;;  %s824_s26 = sshll.u32 %s1330_s14, 3 }
  0x3c   : > { %s825_s30 = sshll.u32 %s1224_s27, 7  ;;  %s256_s1 = scalar_lea.vmem [#allocation2], %s824_s26 }
  0x3d   : > { %p1398_p11 = pnand %p832_p6, %p334_p9  ;;  %s1405_s16 = scalar_lea.hbm %s1594_s0, %s825_s30 }
  0x3e   : > { %s263_s22 = sshll.u32 %s256_s1, 4  ;;  %s253_s19 = scalar_lea.sflag [#allocation3], %s1330_s14  ;;  %s264_s22 = int_to_ptr.vmem [resolvable:$true] %s263_s22 }
  0x3f   : > { %s1629_s13 = scalar_select %p1398_p11, 1, 0 }
  0x40   : > { %s1094_s18 = scalar_lea.hbm %s1405_s16, 128  ;;  %s1099_s27 = scalar_lea.hbm %s1594_s0, 256 }
  0x41   : > { %p1095_p12 = scmp.ne.s32.totalorder %s1405_s16, %s1094_s18  ;;  %p1100_p8 = scmp.lt.u32.totalorder %s1405_s16, %s1594_s0 }
  0x42   : > { %p1101_p10 = scmp.lt.u32.totalorder %s1099_s27, %s1094_s18  ;;  %p1103_p2 = scmp.lt.u32.totalorder %s1094_s18, %s1405_s16 }
  0x43   : > { %p1097_p3 = pnand %p1095_p12, %p1356_p1 }
  0x44   : > { %p1102_p0 = por %p1101_p10, %p1100_p8 }
  0x45   : > { %p1098_p7 = pneg %p1097_p3 }
  0x46   : > { %p1104_p4 = por %p1103_p2, %p1102_p0 }
  0x48   : > { %p1105_p5 = pnand %p1104_p4, %p1098_p7 }
  0x4a   : > { %1108 = shalt.err (!%p1105_p5)
}
  0x4b   : > { %s1109_s26 = scalar_lea.vmem %s264_s22, 128  ;;  %s1229_s14 = smov [#allocation2]  }
  0x4c   : > { %p1110_p6 = scmp.ne.s32.totalorder %s264_s22, %s1109_s26  ;;  %s1114_s23 = sshll.u32 %s1229_s14, 4  ;;  %s1115_s23 = int_to_ptr.vmem [resolvable:$false] %s1114_s23 }
  0x4d   : > { %s1116_s17 = scalar_lea.vmem %s1115_s23, 256  ;;  %p1117_p3 = scmp.lt.s32.totalorder %s264_s22, %s1115_s23 }
  0x4e   : > { %p1112_p9 = pnand %p1110_p6, %p1356_p1  ;;  %p1118_p11 = scmp.lt.s32.totalorder %s1116_s17, %s1109_s26 }
  0x50   : > { %p1113_p12 = pneg %p1112_p9  ;;  %p1119_p13 = por %p1118_p11, %p1117_p3 }
  0x52   : > { %p1120_p8 = pnand %p1119_p13, %p1113_p12 }
  0x54   : > { %1123 = shalt.err (!%p1120_p8)
}
  0x55   : > { %p1630_p10 = scmp.ne.s32.totalorder %s1624_s15, 0  ;;  %s1124_s27 = scalar_lea.hbm %s1388_s20, 2048 }
  0x56   : > { %p1125_p7 = scmp.ne.s32.totalorder %s1388_s20, %s1124_s27  ;;  %s1129_s18 = scalar_lea.hbm %s1597_s3, 4096 }
  0x57   : > { %1010 = dma.hbm_to_vmem [thread:$0]  (!%p1630_p10), %s1405_s16, 128, %s264_s22, %s253_s19  }
  0x58   : > { %p1127_p0 = pnand %p1125_p7, %p1356_p1  ;;  %p1130_p13 = scmp.lt.u32.totalorder %s1388_s20, %s1597_s3 }
  0x59   : > { %p1131_p11 = scmp.lt.u32.totalorder %s1129_s18, %s1124_s27  ;;  %p1133_p5 = scmp.lt.u32.totalorder %s1124_s27, %s1388_s20 }
  0x5a   : > { %p1128_p2 = pneg %p1127_p0 }
  0x5b   : > { %p1132_p4 = por %p1131_p11, %p1130_p13 }
  0x5d   : > { %p1134_p6 = por %p1133_p5, %p1132_p4 }
  0x5f   : > { %p1135_p9 = pnand %p1134_p6, %p1128_p2 }
  0x61   : > { %1138 = shalt.err (!%p1135_p9)
}
  0x62   : > { %s1139_s16 = scalar_lea.vmem %s1392_s10, 2048  ;;  %s1230_s22 = smov [#allocation7]  }
  0x63   : > { %p1140_p12 = scmp.ne.s32.totalorder %s1392_s10, %s1139_s16  ;;  %s1144_s19 = sshll.u32 %s1230_s22, 4  ;;  %s1145_s19 = int_to_ptr.vmem [resolvable:$false] %s1144_s19 }
  0x64   : > { %s1146_s26 = scalar_lea.vmem %s1145_s19, 4096  ;;  %p1147_p7 = scmp.lt.s32.totalorder %s1392_s10, %s1145_s19 }
  0x65   : > { %p1142_p3 = pnand %p1140_p12, %p1356_p1  ;;  %p1148_p0 = scmp.lt.s32.totalorder %s1146_s26, %s1139_s16 }
  0x67   : > { %p1143_p8 = pneg %p1142_p3  ;;  %p1149_p13 = por %p1148_p0, %p1147_p7 }
  0x69   : > { %p1150_p11 = pnand %p1149_p13, %p1143_p8 }
  0x6b   : > { %1153 = shalt.err (!%p1150_p11)
}
  0x6c   : > { %s1631_s14 = smov 8   ;;  %s1632_s23 = smov 128  }
  0x6d   : > { %1016 = dma.hbm_to_vmem [thread:$0]  (!%p1630_p10), %s1388_s20, 2048, %s1392_s10, %s1350_s29, %s1632_s23, %s1632_s23, %s1631_s14  }
  0x6e   : > { %p1633_p1 = scmp.ne.s32.totalorder %s1629_s13, 0 }
  0x6f   : > { %s1453_s9 = sand.u32 (!%p1633_p1), 1, %s1216_s25   ;;  %p1634_p2 = scmp.ne.s32.totalorder (!%p1633_p1), %s1620_s11, 0 }
  0x70   : > { %338 = sbr.rel (%p1633_p1) target bundleno = 811 (0x32b), region = 48  ;;  %s833_s17 = sshll.u32 (!%p1633_p1), %s1453_s9, 3 }
  0x71   : > { %s341_s27 = scalar_lea.sflag (!%p1633_p1), [#allocation3], %s1453_s9  ;;  %s1459_s15 = scalar_lea.vmem (!%p1633_p1), [#allocation2], %s833_s17 }
  0x77   : > { %1199 = dma.done.wait (%p1634_p2), %s341_s27, 128  }
  0x78   : > { %1201 = vsyncadd (%p1634_p2), %s341_s27, 4294967168  ;;  %s349_s10 = sand.u32 1, %s1296_s28   ;;  %s834_s13 = sshll.u32 %s1453_s9, 7 }
  0x79   : > { %s350_s29 = scalar_lea.sflag [#allocation6], %s349_s10  ;;  %s1467_s20 = scalar_lea.vmem [#allocation5], %s834_s13 }
  0x7a   : > { %1203 = dma.done.wait (%p1634_p2), %s350_s29, 4096  }
  0x7b   : > { %1205 = vsyncadd (%p1634_p2), %s350_s29, 4294963200  ;;  %v1231_v0 = vmov 0.0|0.0   ;;  %vm1232_vm0 = vmmov 0   ;;  %v1233_v1 = vmov 0.0   ;;  %v428_v2 = vld [vmem:[%s1467_s20] sm:$0xff]  ;;  %v429_v3 = vld [vmem:[%s1467_s20 + $0x8] sm:$0xff] }
  0x7c   : > { %951 = vmatprep.subr.bf16.mxu0 %v1231_v0  ;;  %913 = vmatprep.mubr.msk.f32.mxu0 %vm1232_vm0, %v1233_v1  ;;  %v430_v4 = vld [vmem:[%s1467_s20 + $0x10] sm:$0xff]  ;;  %v952_v5 = vpack.c.bf16 %v429_v3, %v428_v2  ;;  %v431_v6 = vld [vmem:[%s1467_s20 + $0x18] sm:$0xff]  ;;  %v432_v8 = vld [vmem:[%s1467_s20 + $0x20] sm:$0xff]  ;;  %s1482_s11 = scalar_lea.vmem [#allocation7], %s834_s13  ;;  %p415_p10 = scmp.lt.s32.totalorder %s1296_s28, 1 }
  0x7d   : > { %975 = vmatprep.subr.bf16.mxu1 %v1231_v0  ;;  %948 = vmatprep.mubr.msk.f32.mxu1 %vm1232_vm0, %v1233_v1  ;;  %v955_v7 = vpack.c.bf16 %v431_v6, %v430_v4  ;;  %v433_v9 = vld [vmem:[%s1467_s20 + $0x28] sm:$0xff]  ;;  %v522_v10 = vld [vmem:[%s1482_s11] sm:$0xff]  ;;  %v524_v12 = vld [vmem:[%s1482_s11 + $0x10] sm:$0xff]  ;;  %s842_s10 = sshll.u32 %s1296_s28, 7  ;;  %s414_s13 = scalar_lea.vmem [#allocation8], %s833_s17 }
  0x7e   : > { %953 = vmatpush3.bf16.msra.mxu0 %v952_v5  ;;  %v523_v11 = vld [vmem:[%s1482_s11 + $0x8] sm:$0xff]  ;;  %v525_v13 = vld [vmem:[%s1482_s11 + $0x18] sm:$0xff]  ;;  %v958_v14 = vpack.c.bf16 %v433_v9, %v432_v8  ;;  %v434_v16 = vld [vmem:[%s1467_s20 + $0x30] sm:$0xff]  ;;  %s1526_s8 = scalar_select %p415_p10, %s1296_s28, 1 }
  0x7f   : > { %954 = vmatprep.subr.bf16.mxu0 %v1231_v0  ;;  %v976_v15 = vpack.c.bf16 %v523_v11, %v522_v10  ;;  %v435_v17 = vld [vmem:[%s1467_s20 + $0x38] sm:$0xff]  ;;  %v979_v18 = vpack.c.bf16 %v525_v13, %v524_v12  ;;  %v526_v19 = vld [vmem:[%s1482_s11 + $0x20] sm:$0xff]  ;;  %v527_v20 = vld [vmem:[%s1482_s11 + $0x28] sm:$0xff]  ;;  %s672_s29 = sshll.u32 %s414_s13, 4  ;;  %s659_s1 = scalar_lea.sflag [#allocation4], %s1453_s9  ;;  %s1552_s29 = int_to_ptr.vmem [resolvable:$true] %s672_s29 }
  0x80   : > { %v961_v21 = vpack.c.bf16 %v435_v17, %v434_v16  ;;  %v436_v22 = vld [vmem:[%s1467_s20 + $0x40] sm:$0xff]  ;;  %v437_v23 = vld [vmem:[%s1467_s20 + $0x48] sm:$0xff]  ;;  %v982_v24 = vpack.c.bf16 %v527_v20, %v526_v19  ;;  %v528_v25 = vld [vmem:[%s1482_s11 + $0x30] sm:$0xff]  ;;  %s417_s21 = scalar_lea.vmem %s1596_s2, %s1526_s8  ;;  %s420_s22 = scalar_lea.vmem %s1598_s4, %s1526_s8 }
  0x81   : > { %977 = vmatpush3.bf16.msra.mxu1 %v976_v15  ;;  %v529_v26 = vld [vmem:[%s1482_s11 + $0x38] sm:$0xff]  ;;  %v964_v27 = vpack.c.bf16 %v437_v23, %v436_v22  ;;  %v438_v28 = vld [vmem:[%s1467_s20 + $0x50] sm:$0xff]  ;;  %v530_v31 = vld [vmem:[%s1482_s11 + $0x40] sm:$0xff]  ;;  %s423_s14 = scalar_lea.vmem %s1599_s5, %s1526_s8  ;;  %s1154_s18 = scalar_lea.vmem %s1552_s29, 128 }
  0x82   : > { %956 = vmatpush3.bf16.msra.mxu0 %v955_v7  ;;  %978 = vmatprep.subr.bf16.mxu1 %v1231_v0  ;;  %v439_v29 = vld [vmem:[%s1467_s20 + $0x58] sm:$0xff]  ;;  %v985_v30 = vpack.c.bf16 %v529_v26, %v528_v25  ;;  %v531_v32 = vld [vmem:[%s1482_s11 + $0x48] sm:$0xff]  ;;  %v440_v34 = vld [vmem:[%s1467_s20 + $0x60] sm:$0xff]  ;;  %p1155_p4 = scmp.ne.s32.totalorder %s1552_s29, %s1154_s18  ;;  %p1635_p5 = scmp.ne.s32.totalorder %s1621_s12, 0 }
  0x83   : > { %957 = vmatprep.subr.bf16.mxu0 %v1231_v0  ;;  %v967_v33 = vpack.c.bf16 %v439_v29, %v438_v28  ;;  %v441_v35 = vld [vmem:[%s1467_s20 + $0x68] sm:$0xff]  ;;  %v988_v36 = vpack.c.bf16 %v531_v32, %v530_v31  ;;  %v532_v37 = vld [vmem:[%s1482_s11 + $0x50] sm:$0xff]  ;;  %v533_v38 = vld [vmem:[%s1482_s11 + $0x58] sm:$0xff]  ;;  %s1234_s28 = smov [#allocation8]  }
  0x84   : > { %v970_v39 = vpack.c.bf16 %v441_v35, %v440_v34  ;;  %v442_v40 = vld [vmem:[%s1467_s20 + $0x70] sm:$0xff]  ;;  %v443_v41 = vld [vmem:[%s1467_s20 + $0x78] sm:$0xff]  ;;  %v991_v42 = vpack.c.bf16 %v533_v38, %v532_v37  ;;  %v534_v43 = vld [vmem:[%s1482_s11 + $0x60] sm:$0xff]  ;;  %p1156_p6 = pnand %p1155_p4, %p1635_p5  ;;  %s1158_s17 = sshll.u32 %s1234_s28, 4  ;;  %s1159_s17 = int_to_ptr.vmem [resolvable:$false] %s1158_s17 }
  0x85   : > { %980 = vmatpush3.bf16.msra.mxu1 %v979_v18  ;;  %v535_v44 = vld [vmem:[%s1482_s11 + $0x68] sm:$0xff]  ;;  %v973_v45 = vpack.c.bf16 %v443_v41, %v442_v40  ;;  %v427_v47 = vld [vmem:[%s1459_s15] sm:$0xff]  ;;  %s426_s15 = scalar_lea.vmem %s1600_s6, %s1526_s8  ;;  %s1550_s8 = scalar_lea.hbm %s1601_s7, %s842_s10 }
  0x86   : > { %959 = vmatpush3.bf16.msra.mxu0 %v958_v14  ;;  %981 = vmatprep.subr.bf16.mxu1 %v1231_v0  ;;  %v994_v46 = vpack.c.bf16 %v535_v44, %v534_v43  ;;  %v536_v48 = vld [vmem:[%s1482_s11 + $0x70] sm:$0xff]  ;;  %v537_v49 = vld [vmem:[%s1482_s11 + $0x78] sm:$0xff]  ;;  %p1157_p9 = pneg %p1156_p6  ;;  %p1161_p12 = scmp.lt.s32.totalorder %s1552_s29, %s1159_s17 }
  0x87   : > { %960 = vmatprep.subr.bf16.mxu0 %v1231_v0  ;;  %v997_v50 = vpack.c.bf16 %v537_v49, %v536_v48  ;;  %v837_v51 = vld [vmem:[%s417_s21] ss:$0 sm:$0xff]  ;;  %s1160_s21 = scalar_lea.vmem %s1159_s17, 256 }
  0x88   : > { %v838_v56 = vld [vmem:[%s420_s22] ss:$0 sm:$0xff]  ;;  %p1162_p3 = scmp.lt.s32.totalorder %s1160_s21, %s1154_s18 }
  0x89   : > { %983 = vmatpush3.bf16.msra.mxu1 %v982_v24  ;;  %v839_v14 = vld [vmem:[%s423_s14] ss:$0 sm:$0xff] }
  0x8a   : > { %962 = vmatpush3.bf16.msra.mxu0 %v961_v21  ;;  %984 = vmatprep.subr.bf16.mxu1 %v1231_v0  ;;  %v840_v16 = vld [vmem:[%s426_s15] ss:$0 sm:$0xff]  ;;  %p1163_p8 = por %p1162_p3, %p1161_p12 }
  0x8b   : > { %963 = vmatprep.subr.bf16.mxu0 %v1231_v0 }
  0x8c   : > { %p1164_p7 = pnand %p1163_p8, %p1157_p9 }
  0x8d   : > { %986 = vmatpush3.bf16.msra.mxu1 %v985_v30 }
  0x8e   : > { %965 = vmatpush3.bf16.msra.mxu0 %v964_v27  ;;  %987 = vmatprep.subr.bf16.mxu1 %v1231_v0 }
  0x8f   : > { %966 = vmatprep.subr.bf16.mxu0 %v1231_v0 }
  0x91   : > { %989 = vmatpush3.bf16.msra.mxu1 %v988_v36 }
  0x92   : > { %968 = vmatpush3.bf16.msra.mxu0 %v967_v33  ;;  %990 = vmatprep.subr.bf16.mxu1 %v1231_v0 }
  0x93   : > { %969 = vmatprep.subr.bf16.mxu0 %v1231_v0 }
  0x95   : > { %992 = vmatpush3.bf16.msra.mxu1 %v991_v42 }
  0x96   : > { %971 = vmatpush3.bf16.msra.mxu0 %v970_v39  ;;  %993 = vmatprep.subr.bf16.mxu1 %v1231_v0 }
  0x97   : > { %972 = vmatprep.subr.bf16.mxu0 %v1231_v0 }
  0x99   : > { %995 = vmatpush3.bf16.msra.mxu1 %v994_v46 }
  0x9a   : > { %974 = vmatpush3.bf16.msra.mxu0 %v973_v45  ;;  %996 = vmatprep.subr.bf16.mxu1 %v1231_v0 }
  0x9d   : > { %914 = vmatmul.mubr.f32.vlgmr.msra.gmra.mrb[0].mxu0 %v427_v47  ;;  %998 = vmatpush3.bf16.msra.mxu1 %v997_v50 }
 0x170   : > { %v517_v52 = vpop.f32.mrb[0].mxu0 }
 0x171   : > { %v518_v53 = vadd.f32 %v837_v51, %v517_v52  ;;  %v915_v54 = vpop.f32.mrb[1].mxu0 }
 0x173   : > { %v521_v55 = vmax.f32 %v518_v53, 0.0 }
 0x175   : > { %949 = vmatmul.mubr.f32.vlgmr.msra.gmra.mrb[0].mxu1 %v521_v55 }
 0x248   : > { %v611_v57 = vpop.f32.mrb[0].mxu1 }
 0x249   : > { %v612_v58 = vadd.f32 %v838_v56, %v611_v57  ;;  %v950_v59 = vpop.f32.mrb[1].mxu1 }
 0x24b   : > { %v615_v60 = vrot.slane %v612_v58, 4 }
 0x24d   : > { %v616_v61 = vadd.f32 %v615_v60, %v612_v58 }
 0x24f   : > { %v617_v62 = vrot.slane %v616_v61, 2 }
 0x251   : > { %v618_v63 = vadd.f32 %v617_v62, %v616_v61 }
 0x253   : > { %v619_v0 = vrot.slane %v618_v63, 1 }
 0x255   : > { %v620_v1 = vadd.f32 %v619_v0, %v618_v63 }
 0x257   : > { %v622_v2 = vmul.f32 0.125, %v620_v1 }
 0x259   : > { %v623_v3 = vsub.f32 %v612_v58, %v622_v2 }
 0x25b   : > { %v624_v4 = vmul.f32 %v623_v3, %v623_v3 }
 0x25d   : > { %v625_v5 = vrot.slane %v624_v4, 4 }
 0x25f   : > { %v626_v6 = vadd.f32 %v625_v5, %v624_v4 }
 0x261   : > { %v627_v7 = vrot.slane %v626_v6, 2 }
 0x263   : > { %v628_v8 = vadd.f32 %v627_v7, %v626_v6 }
 0x265   : > { %v629_v9 = vrot.slane %v628_v8, 1 }
 0x267   : > { %v630_v10 = vadd.f32 %v629_v9, %v628_v8 }
 0x269   : > { %v631_v11 = vmul.f32 0.125, %v630_v10 }
 0x26b   : > { %v632_v12 = vadd.f32 1e-05, %v631_v11 }
 0x26d   : > { %1060 = vrsqrt.f32 %v632_v12 }
 0x277   : > { %v1061_v13 = vpop.eup %1060 }
 0x278   : > { %v634_v15 = vmul.f32 %v1061_v13, %v623_v3 }
 0x27a   : > { %v642_v17 = vmul.f32 %v839_v14, %v634_v15 }
 0x27c   : > { %v650_v18 = vadd.f32 %v840_v16, %v642_v17 }
 0x27e   : > { %v651_v19 = vmul.f32 %v650_v18, %v650_v18 }
 0x280   : > { %652 = vadd.xlane.f32.xlu0 %v651_v19 }
 0x30d   : > { %v653_v20 = vpop.xlane.xlu0 %652 }
 0x30e   : > { %v654_v21 = vmax.f32 %v653_v20, 1e-24 }
 0x310   : > { %1062 = vrsqrt.f32 %v654_v21 }
 0x31a   : > { %v1063_v22 = vpop.eup %1062 }
 0x31b   : > { %v656_v23 = vmul.f32 %v1063_v22, %v650_v18 }
 0x31d   : > { %657 = vst [vmem:[%s414_s13] sm:$0xff] %v656_v23 }
 0x31e   : > { %1167 = shalt.err (!%p1164_p7)
}
 0x31f   : > { %s1168_s9 = scalar_lea.hbm %s1550_s8, 128  ;;  %s1172_s22 = scalar_lea.hbm %s1601_s7, 256 }
 0x320   : > { %p1169_p0 = scmp.ne.s32.totalorder %s1550_s8, %s1168_s9  ;;  %p1173_p1 = scmp.lt.u32.totalorder %s1550_s8, %s1601_s7 }
 0x321   : > { %p1174_p2 = scmp.lt.u32.totalorder %s1172_s22, %s1168_s9  ;;  %p1176_p4 = scmp.lt.u32.totalorder %s1168_s9, %s1550_s8 }
 0x322   : > { %p1170_p13 = pnand %p1169_p0, %p1635_p5 }
 0x323   : > { %p1175_p10 = por %p1174_p2, %p1173_p1 }
 0x324   : > { %p1171_p11 = pneg %p1170_p13 }
 0x325   : > { %p1177_p6 = por %p1176_p4, %p1175_p10 }
 0x327   : > { %p1178_p9 = pnand %p1177_p6, %p1171_p11 }
 0x329   : > { %1181 = shalt.err (!%p1178_p9)
}
 0x32a   : > { %1005 = dma.vmem_to_hbm [thread:$0]  (%p1635_p5), %s1552_s29, 128, %s1550_s8, %s659_s1  }
 0x32b PF: > { %s1636_s14 = sld [smem:[#allocation16_spill]]  ;;  %s1637_s23 = sld [smem:[#allocation13_spill]] }
 0x32c   : > { %s684_s27 = sand.u32 1, %s1212_s24  }
 0x32d   : > { %s685_s15 = scalar_lea.sflag [#allocation4], %s684_s27 }
 0x331   : > { %p1638_p12 = scmp.ne.s32.totalorder %s1636_s14, 0  ;;  %p1639_p3 = scmp.ge.s32.totalorder %s1637_s23, 2 }
 0x333   : > { %p1018_p8 = pnand %p1639_p3, %p1638_p12 }
 0x335   : > { %1207 = dma.done.wait (!%p1018_p8), %s685_s15, 128  }
 0x336   : > { %1209 = vsyncadd (!%p1018_p8), %s685_s15, 4294967168  ;;  %s1640_s27 = sld [smem:[#allocation14_spill]]  ;;  %s1641_s10 = sld [smem:[#allocation12_spill]] }
 0x337   : > { %s1642_s26 = sld [smem:[#allocation15_spill]]  ;;  %s1643_s24 = smov %s1216_s25 }
 0x33c   : > { %p23_p7 = scmp.ge.s32.totalorder %s1640_s27, 4   ;;  %s1644_s25 = smov %s1641_s10 }
 0x33e   :  { %25 = sbr.rel (!%p23_p7) target bundleno = 9 (0x9), region = 129 }
 0x345   :  { %690 = vsyncpa [#allocation3], 1 }
 0x346   :  { %692 = vsyncpa [#allocation3 + $0x1], 1 }
 0x347   :  { %693 = vsyncpa [#allocation6], 1 }
 0x348   :  { %695 = vsyncpa [#allocation6 + $0x1], 1 }
 0x349   :  { %696 = vsyncpa [#allocation4], 1 }
 0x34a   :  { %698 = vsyncpa [#allocation4 + $0x1], 1 }

</bundles_post_ra>
